<compile_context>
chip_gen: v7x
topology: tpu7x:2x2x1
jax: 0.10.0
libtpu: 0.0.40
codegen_flags: <defaults>
</compile_context>

<pallas_src>
import functools

import jax
import jax.numpy as jnp
from jax.experimental import pallas as pl
from jax.experimental.pallas import tpu as pltpu

LANE = 128  # lane width: pad feature dims to multiples of this
SUBLANE = 8


def _round_up(n, m):
    return ((n + m - 1) // m) * m


def _mlp_kernel(x_ref, w1_ref, b1_ref, w2_ref, b2_ref, o_ref):
    # fc1: [TILE_B, In_p](bf16) @ [In_p, H_p](bf16) -> fp32 accumulate on MXU.
    h = jnp.dot(x_ref[...], w1_ref[...], preferred_element_type=jnp.float32)
    h = h + b1_ref[...]
    # dropout (p=0.5) in eval mode -> identity.
    # TODO(synk): training-mode dropout via pltpu.prng_seed/prng_random_bits is
    #             not wired in; this matches model.eval() semantics.
    h = jnp.maximum(h, 0.0)  # ReLU
    # fc2: [TILE_B, H_p](bf16) @ [H_p, Out_p](bf16) -> fp32 accumulate on MXU.
    y = jnp.dot(h.astype(jnp.bfloat16), w2_ref[...],
                preferred_element_type=jnp.float32)
    y = y + b2_ref[...]
    o_ref[...] = y.astype(o_ref.dtype)


def prepare_params(w1, b1, w2, b2):
    """One-time parameter prep (init-time, NOT per forward call):

    - transpose PyTorch [out, in] weights to [in, out] (MXU-friendly RHS),
    - zero-pad feature dims to 128-lane multiples (lane-dense ops / stores),
    - cast weights to bf16 for native MXU throughput (biases stay fp32).
    Zero padding is exact: padded hidden columns give relu(0 + 0) = 0 and padded
    w2 rows/cols contribute 0; the wrapper slices the padding off afterwards.
    """
    H, In = w1.shape
    Out = w2.shape[0]
    In_p, H_p, Out_p = (_round_up(d, LANE) for d in (In, H, Out))

    w1_t = jnp.zeros((In_p, H_p), jnp.bfloat16).at[:In, :H].set(
        jnp.transpose(w1).astype(jnp.bfloat16))
    w2_t = jnp.zeros((H_p, Out_p), jnp.bfloat16).at[:H, :Out].set(
        jnp.transpose(w2).astype(jnp.bfloat16))
    b1_p = jnp.zeros((1, H_p), jnp.float32).at[0, :H].set(b1.astype(jnp.float32))
    b2_p = jnp.zeros((1, Out_p), jnp.float32).at[0, :Out].set(b2.astype(jnp.float32))
    return w1_t, b1_p, w2_t, b2_p, Out


@functools.partial(jax.jit, static_argnames=("out_features",))
def simple_mlp_forward(x, w1_t, b1_p, w2_t, b2_p, out_features):
    """x: [B, In] fp32; params from prepare_params(). Returns [B, Out] fp32."""
    B, In = x.shape
    In_p, H_p = w1_t.shape
    Out_p = w2_t.shape[1]

    # Batch tile: big enough for good pipelining at real batch sizes, exact
    # (sublane-rounded) for tiny batches; bounded so double-buffered x/out tiles
    # plus resident weights fit comfortably in scoped VMEM on v5e/v6e/v7x.
    TILE_B = 256 if B >= 256 else _round_up(B, SUBLANE)
    B_p = _round_up(B, TILE_B)

    # bf16 input (halves x DMA bytes); zero-pad batch + feature dims.
    x_p = jnp.zeros((B_p, In_p), jnp.bfloat16).at[:B, :In].set(
        x.astype(jnp.bfloat16))

    grid = (B_p // TILE_B,)

    flops = 2 * B_p * In_p * H_p + 2 * B_p * H_p * Out_p
    bytes_accessed = (x_p.size * 2 + w1_t.size * 2 + w2_t.size * 2
                      + b1_p.size * 4 + b2_p.size * 4 + B_p * Out_p * 4)

    out_p = pl.pallas_call(
        _mlp_kernel,
        out_shape=jax.ShapeDtypeStruct((B_p, Out_p), jnp.float32),
        grid=grid,
        in_specs=[
            # x: tiled along batch, auto double-buffered across grid steps.
            pl.BlockSpec((TILE_B, In_p), lambda i: (i, 0)),
            # weights / biases: constant index_map -> stay resident in VMEM.
            pl.BlockSpec((In_p, H_p), lambda i: (0, 0)),
            pl.BlockSpec((1, H_p), lambda i: (0, 0)),
            pl.BlockSpec((H_p, Out_p), lambda i: (0, 0)),
            pl.BlockSpec((1, Out_p), lambda i: (0, 0)),
        ],
        out_specs=pl.BlockSpec((TILE_B, Out_p), lambda i: (i, 0)),
        compiler_params=pltpu.CompilerParams(
            dimension_semantics=("parallel",),  # shard batch across TCs on v7x
        ),
        cost_estimate=pl.CostEstimate(
            flops=flops, transcendentals=0, bytes_accessed=bytes_accessed),
    )(x_p, w1_t, b1_p, w2_t, b2_p)

    # Slice away batch + lane padding.
    return out_p[:B, :out_features]


def reference_forward(x, w1, b1, w2, b2):
    h = x @ w1.T + b1
    h = jnp.maximum(h, 0.0)
    return h @ w2.T + b2


if __name__ == "__main__":
    # Small shapes consistent with the module: batch=8, input=32, hidden=64, output=16.
    B, INPUT, HIDDEN, OUTPUT = 8, 32, 64, 16

    key = jax.random.PRNGKey(0)
    kx, k1, k2, k3, k4 = jax.random.split(key, 5)

    x = jax.random.normal(kx, (B, INPUT), dtype=jnp.float32)
    # Deterministic "Kaiming-ish" init for the Linear layers (PyTorch [out, in] shapes).
    w1 = jax.random.normal(k1, (HIDDEN, INPUT), dtype=jnp.float32) * (1.0 / INPUT) ** 0.5
    b1 = jax.random.normal(k2, (HIDDEN,), dtype=jnp.float32) * 0.01
    w2 = jax.random.normal(k3, (OUTPUT, HIDDEN), dtype=jnp.float32) * (1.0 / HIDDEN) ** 0.5
    b2 = jax.random.normal(k4, (OUTPUT,), dtype=jnp.float32) * 0.01

    # One-time param prep (transpose + pad + bf16 cast), then the fused kernel.
    w1_t, b1_p, w2_t, b2_p, out_features = prepare_params(w1, b1, w2, b2)
    out = simple_mlp_forward(x, w1_t, b1_p, w2_t, b2_p, out_features)
    out = jax.block_until_ready(out)

    ref = reference_forward(x, w1, b1, w2, b2)
    assert out.shape == (B, OUTPUT)
    # bf16 MXU operands (fp32 accumulation) -> tolerance relaxed vs pure-fp32 path.
    assert jnp.allclose(out, ref, atol=5e-2, rtol=5e-2), (
        f"max abs err {jnp.max(jnp.abs(out - ref))}")

    print("KERNEL_OK")
</pallas_src>

<mosaic_0001>
module attributes {stable_mosaic.version = 11 : i64} {
  func.func @_mlp_kernel(%arg0: i32, %arg1: memref<8x128xbf16, #tpu.memory_space<vmem>>, %arg2: memref<128x128xbf16, #tpu.memory_space<vmem>>, %arg3: memref<1x128xf32, #tpu.memory_space<vmem>>, %arg4: memref<128x128xbf16, #tpu.memory_space<vmem>>, %arg5: memref<1x128xf32, #tpu.memory_space<vmem>>, %arg6: memref<8x128xf32, #tpu.memory_space<vmem>>) attributes {dimension_semantics = [#tpu.dimension_semantics<parallel>], iteration_bounds = array<i64: 1>, scalar_prefetch = 0 : i64, scratch_operands = 0 : i64, tpu.core_type = #tpu.core_type<tc>, window_params = [{transform_indices = @transform_0, window_bounds = array<i64: 8, 128>}, {pipeline_mode = #tpu.pipeline_mode<synchronous>, transform_indices = @transform_1, window_bounds = array<i64: 128, 128>}, {pipeline_mode = #tpu.pipeline_mode<synchronous>, transform_indices = @transform_2, window_bounds = array<i64: 1, 128>}, {pipeline_mode = #tpu.pipeline_mode<synchronous>, transform_indices = @transform_3, window_bounds = array<i64: 128, 128>}, {pipeline_mode = #tpu.pipeline_mode<synchronous>, transform_indices = @transform_4, window_bounds = array<i64: 1, 128>}, {transform_indices = @transform_5, window_bounds = array<i64: 8, 128>}]} {
    %c0 = arith.constant 0 : index
    %c0_0 = arith.constant 0 : index
    %0 = vector.load %arg1[%c0, %c0_0] : memref<8x128xbf16, #tpu.memory_space<vmem>>, vector<8x128xbf16>
    %c0_1 = arith.constant 0 : index
    %c0_2 = arith.constant 0 : index
    %1 = vector.load %arg2[%c0_1, %c0_2] : memref<128x128xbf16, #tpu.memory_space<vmem>>, vector<128x128xbf16>
    %cst = arith.constant dense<0.000000e+00> : vector<8x128xf32>
    %2 = tpu.matmul %0, %1, %cst {dimension_numbers = #tpu.dot_dimension_numbers<[1], [0], [0], [1], [0, 0, 1, 1], [], []>} : vector<8x128xbf16>, vector<128x128xbf16>, vector<8x128xf32> -> vector<8x128xf32>
    %c0_3 = arith.constant 0 : index
    %c0_4 = arith.constant 0 : index
    %3 = vector.load %arg3[%c0_3, %c0_4] : memref<1x128xf32, #tpu.memory_space<vmem>>, vector<1x128xf32>
    %4 = vector.broadcast %3 : vector<1x128xf32> to vector<8x128xf32>
    %5 = arith.addf %2, %4 : vector<8x128xf32>
    %cst_5 = arith.constant 0.000000e+00 : f32
    %6 = vector.broadcast %cst_5 : f32 to vector<8x128xf32>
    %7 = arith.maximumf %5, %6 : vector<8x128xf32>
    %8 = arith.truncf %7 : vector<8x128xf32> to vector<8x128xbf16>
    %c0_6 = arith.constant 0 : index
    %c0_7 = arith.constant 0 : index
    %9 = vector.load %arg4[%c0_6, %c0_7] : memref<128x128xbf16, #tpu.memory_space<vmem>>, vector<128x128xbf16>
    %cst_8 = arith.constant dense<0.000000e+00> : vector<8x128xf32>
    %10 = tpu.matmul %8, %9, %cst_8 {dimension_numbers = #tpu.dot_dimension_numbers<[1], [0], [0], [1], [0, 0, 1, 1], [], []>} : vector<8x128xbf16>, vector<128x128xbf16>, vector<8x128xf32> -> vector<8x128xf32>
    %c0_9 = arith.constant 0 : index
    %c0_10 = arith.constant 0 : index
    %11 = vector.load %arg5[%c0_9, %c0_10] : memref<1x128xf32, #tpu.memory_space<vmem>>, vector<1x128xf32>
    %12 = vector.broadcast %11 : vector<1x128xf32> to vector<8x128xf32>
    %13 = arith.addf %10, %12 : vector<8x128xf32>
    %c0_11 = arith.constant 0 : index
    %c0_12 = arith.constant 0 : index
    %14 = vector.load %arg6[%c0_11, %c0_12] : memref<8x128xf32, #tpu.memory_space<vmem>>, vector<8x128xf32>
    tpu.vector_store %arg6[%c0_11, %c0_12], %13 {strides = array<i32>} : memref<8x128xf32, #tpu.memory_space<vmem>>, vector<8x128xf32>,
    return
  }
  func.func @transform_0(%arg0: i32) -> (i32, i32) {
    %c0_i32 = arith.constant 0 : i32
    %c0_i32_0 = arith.constant 0 : i32
    return %arg0, %c0_i32 : i32, i32
  }
  func.func @transform_1(%arg0: i32) -> (i32, i32) {
    %c0_i32 = arith.constant 0 : i32
    %c0_i32_0 = arith.constant 0 : i32
    %c0_i32_1 = arith.constant 0 : i32
    return %c0_i32, %c0_i32_0 : i32, i32
  }
  func.func @transform_2(%arg0: i32) -> (i32, i32) {
    %c0_i32 = arith.constant 0 : i32
    %c0_i32_0 = arith.constant 0 : i32
    %c0_i32_1 = arith.constant 0 : i32
    return %c0_i32, %c0_i32_0 : i32, i32
  }
  func.func @transform_3(%arg0: i32) -> (i32, i32) {
    %c0_i32 = arith.constant 0 : i32
    %c0_i32_0 = arith.constant 0 : i32
    %c0_i32_1 = arith.constant 0 : i32
    return %c0_i32, %c0_i32_0 : i32, i32
  }
  func.func @transform_4(%arg0: i32) -> (i32, i32) {
    %c0_i32 = arith.constant 0 : i32
    %c0_i32_0 = arith.constant 0 : i32
    %c0_i32_1 = arith.constant 0 : i32
    return %c0_i32, %c0_i32_0 : i32, i32
  }
  func.func @transform_5(%arg0: i32) -> (i32, i32) {
    %c0_i32 = arith.constant 0 : i32
    %c0_i32_0 = arith.constant 0 : i32
    return %arg0, %c0_i32 : i32, i32
  }
}

</mosaic_0001>

<bundles_post_ra>
// kernel: simple_mlp_forward.1
= control target key start
LH: loop header
LB: loop body
LE: loop exit
PB: predicated region body
PF: predicated region fallthrough
CT: control target
= control target key end

     0   :  { %10 = vsyncpa [#allocation3], 0  ;;  %s545_s0 = inlined_call_operand.vmem [shape: bf16[8,128], index: 0, kind: input, shape index: {}]   ;;  %s546_s1 = inlined_call_operand.hbm [shape: bf16[128,128], index: 1, kind: input, shape index: {}]   ;;  %s547_s2 = inlined_call_operand.vmem [shape: f32[1,128], index: 2, kind: input, shape index: {}]   ;;  %s548_s3 = inlined_call_operand.hbm [shape: bf16[128,128], index: 3, kind: input, shape index: {}]   ;;  %s549_s4 = inlined_call_operand.vmem [shape: f32[1,128], index: 4, kind: input, shape index: {}]   ;;  %s550_s5 = inlined_call_operand.hbm [shape: f32[8,128], index: 5, kind: output, shape index: {}]  }
   0x1   :  { %11 = vsyncpa [#allocation6], 0 }
   0x2   :  { %12 = vsyncpa [#allocation4], 0  ;;  %s463_s18 = smov [#allocation2]   ;;  %s391_s22 = scalar_lea.hbm %s546_s1, 1024 }
   0x3   :  { %s20_s19 = sshll.u32 %s463_s18, 4  ;;  %p392_p0 = scmp.ne.s32.totalorder %s546_s1, %s391_s22  ;;  %s21_s19 = int_to_ptr.vmem [resolvable:$true] %s20_s19 }
   0x4   :  { %p395_p1 = scmp.lt.u32.totalorder %s391_s22, %s546_s1 }
   0x6   :  { %p397_p2 = pnand %p395_p1, %p392_p0 }
   0x8   :  { %400 = shalt.err (!%p397_p2)
}
   0x9   :  { %s401_s27 = scalar_lea.vmem %s21_s19, 1024  ;;  %p406_p4 = scmp.lt.s32.totalorder %s21_s19, %s21_s19 }
   0xa   :  { %p402_p3 = scmp.ne.s32.totalorder %s21_s19, %s401_s27  ;;  %p407_p5 = scmp.lt.s32.totalorder %s401_s27, %s401_s27 }
   0xc   :  { %p408_p6 = por %p407_p5, %p406_p4 }
   0xe   :  { %p409_p7 = pnand %p408_p6, %p402_p3 }
  0x10   :  { %412 = shalt.err (!%p409_p7)
}
  0x11   :  { %s464_s28 = smov 64   ;;  %s465_s29 = smov 4  }
  0x12   :  { %26 = dma.hbm_to_vmem [thread:$0]  %s546_s1, 1024, %s21_s19, [#allocation3], %s464_s28, %s464_s28, %s465_s29  }
  0x13   :  { %s466_s7 = smov [#allocation5]   ;;  %s413_s11 = scalar_lea.hbm %s548_s3, 1024 }
  0x14   :  { %s34_s8 = sshll.u32 %s466_s7, 4  ;;  %p414_p8 = scmp.ne.s32.totalorder %s548_s3, %s413_s11  ;;  %s35_s8 = int_to_ptr.vmem [resolvable:$true] %s34_s8 }
  0x15   :  { %p417_p9 = scmp.lt.u32.totalorder %s413_s11, %s548_s3 }
  0x17   :  { %p419_p10 = pnand %p417_p9, %p414_p8 }
  0x19   :  { %422 = shalt.err (!%p419_p10)
}
  0x1a   :  { %s423_s16 = scalar_lea.vmem %s35_s8, 1024  ;;  %p428_p12 = scmp.lt.s32.totalorder %s35_s8, %s35_s8 }
  0x1b   :  { %p424_p11 = scmp.ne.s32.totalorder %s35_s8, %s423_s16  ;;  %p429_p13 = scmp.lt.s32.totalorder %s423_s16, %s423_s16 }
  0x1d   :  { %p430_p0 = por %p429_p13, %p428_p12 }
  0x1f   :  { %p431_p1 = pnand %p430_p0, %p424_p11 }
  0x21   :  { %434 = shalt.err (!%p431_p1)
}
  0x22   :  { %40 = dma.hbm_to_vmem [thread:$0]  %s548_s3, 1024, %s35_s8, [#allocation6], %s464_s28, %s464_s28, %s465_s29  }
  0x23   :  { %457 = dma.done.wait [#allocation3], 1024  }
  0x24   :  { %458 = vsyncadd [#allocation3], 4294966272 }
  0x25   :  { %459 = dma.done.wait [#allocation6], 1024  }
  0x26   :  { %460 = vsyncadd [#allocation6], 4294966272  ;;  %v467_v0 = vmov 0.0   ;;  %vm468_vm0 = vmmov 0   ;;  %v375_v1 = vld [vmem:[#allocation2] sm:$0xff]   ;;  %v376_v2 = vld [vmem:[#allocation2 + $0x8] sm:$0xff]  }
  0x27   :  { %328 = vmatprep.subr.bf16.mxu0 %v467_v0  ;;  %344 = vmatprep.mubr.msk.bf16.mxu0 %vm468_vm0, %v467_v0  ;;  %v377_v3 = vld [vmem:[#allocation2 + $0x10] sm:$0xff]   ;;  %v383_v4 = vld [vmem:[#allocation5] sm:$0xff]   ;;  %v378_v5 = vld [vmem:[#allocation2 + $0x18] sm:$0xff]   ;;  %s469_s22 = smov [#allocation7]  }
  0x28   :  { %348 = vmatprep.subr.bf16.mxu1 %v467_v0  ;;  %364 = vmatprep.mubr.msk.bf16.mxu1 %vm468_vm0, %v467_v0  ;;  %v384_v6 = vld [vmem:[#allocation5 + $0x8] sm:$0xff]   ;;  %v379_v7 = vld [vmem:[#allocation2 + $0x20] sm:$0xff]   ;;  %v385_v8 = vld [vmem:[#allocation5 + $0x10] sm:$0xff]   ;;  %s282_s23 = sshll.u32 %s469_s22, 4  ;;  %s283_s23 = int_to_ptr.vmem [resolvable:$true] %s282_s23 }
  0x29   :  { %329 = vmatpush3.bf16.msra.mxu0 %v375_v1  ;;  %349 = vmatpush3.bf16.msra.mxu1 %v383_v4  ;;  %v380_v9 = vld [vmem:[#allocation2 + $0x28] sm:$0xff]   ;;  %v386_v10 = vld [vmem:[#allocation5 + $0x18] sm:$0xff]   ;;  %v381_v11 = vld [vmem:[#allocation2 + $0x30] sm:$0xff]   ;;  %p440_p3 = scmp.lt.s32.totalorder %s283_s23, %s283_s23 }
  0x2a   :  { %330 = vmatprep.subr.bf16.mxu0 %v467_v0  ;;  %350 = vmatprep.subr.bf16.mxu1 %v467_v0  ;;  %v387_v12 = vld [vmem:[#allocation5 + $0x20] sm:$0xff]   ;;  %v382_v13 = vld [vmem:[#allocation2 + $0x38] sm:$0xff]   ;;  %v388_v14 = vld [vmem:[#allocation5 + $0x28] sm:$0xff]  }
  0x2b   :  { %v50_v15 = vld [vmem:[%s545_s0] sm:$0xf]  ;;  %v389_v16 = vld [vmem:[#allocation5 + $0x30] sm:$0xff]   ;;  %v390_v17 = vld [vmem:[#allocation5 + $0x38] sm:$0xff]  }
  0x2c   :  { %v292_v18 = vld [vmem:[%s547_s2] ss:$0 sm:$0xff]  ;;  %s435_s2 = scalar_lea.vmem %s283_s23, 128 }
  0x2d   :  { %331 = vmatpush3.bf16.msra.mxu0 %v376_v2  ;;  %351 = vmatpush3.bf16.msra.mxu1 %v384_v6  ;;  %v301_v26 = vld [vmem:[%s549_s4] ss:$0 sm:$0xff]  ;;  %p436_p2 = scmp.ne.s32.totalorder %s283_s23, %s435_s2  ;;  %p441_p4 = scmp.lt.s32.totalorder %s435_s2, %s435_s2 }
  0x2e   :  { %332 = vmatprep.subr.bf16.mxu0 %v467_v0  ;;  %352 = vmatprep.subr.bf16.mxu1 %v467_v0 }
  0x2f   :  { %p442_p5 = por %p441_p4, %p440_p3 }
  0x31   :  { %333 = vmatpush3.bf16.msra.mxu0 %v377_v3  ;;  %353 = vmatpush3.bf16.msra.mxu1 %v385_v8  ;;  %p443_p6 = pnand %p442_p5, %p436_p2 }
  0x32   :  { %334 = vmatprep.subr.bf16.mxu0 %v467_v0  ;;  %354 = vmatprep.subr.bf16.mxu1 %v467_v0 }
  0x35   :  { %335 = vmatpush3.bf16.msra.mxu0 %v378_v5  ;;  %355 = vmatpush3.bf16.msra.mxu1 %v386_v10 }
  0x36   :  { %336 = vmatprep.subr.bf16.mxu0 %v467_v0  ;;  %356 = vmatprep.subr.bf16.mxu1 %v467_v0 }
  0x39   :  { %337 = vmatpush3.bf16.msra.mxu0 %v379_v7  ;;  %357 = vmatpush3.bf16.msra.mxu1 %v387_v12 }
  0x3a   :  { %338 = vmatprep.subr.bf16.mxu0 %v467_v0  ;;  %358 = vmatprep.subr.bf16.mxu1 %v467_v0 }
  0x3d   :  { %339 = vmatpush3.bf16.msra.mxu0 %v380_v9  ;;  %359 = vmatpush3.bf16.msra.mxu1 %v388_v14 }
  0x3e   :  { %340 = vmatprep.subr.bf16.mxu0 %v467_v0  ;;  %360 = vmatprep.subr.bf16.mxu1 %v467_v0 }
  0x41   :  { %341 = vmatpush3.bf16.msra.mxu0 %v381_v11  ;;  %361 = vmatpush3.bf16.msra.mxu1 %v389_v16 }
  0x42   :  { %342 = vmatprep.subr.bf16.mxu0 %v467_v0  ;;  %362 = vmatprep.subr.bf16.mxu1 %v467_v0 }
  0x45   :  { %343 = vmatpush3.bf16.msra.mxu0 %v382_v13  ;;  %363 = vmatpush3.bf16.msra.mxu1 %v390_v17 }
  0x48   :  { %345 = vmatmul.mubr.bf16.vlgmr.msra.gmra.mrb[0].mxu0 %v50_v15 }
 0x11b   :  { %v156_v19 = vpop.f32.mrb[0].mxu0 }
 0x11c   :  { %v157_v20 = vadd.f32 %v292_v18, %v156_v19  ;;  %v346_v21 = vpop.f32.mrb[1].mxu0 }
 0x11d   :  { %v159_v22 = vpop.f32.mrb[2].mxu0 }
 0x11e   :  { %v162_v23 = vmax.f32 %v157_v20, 0.0  ;;  %v347_v24 = vpop.f32.mrb[3].mxu0 }
 0x120   :  { %v163_v25 = vpack.c.bf16 %v162_v23, %v162_v23 }
 0x122   :  { %365 = vmatmul.mubr.bf16.vlgmr.msra.gmra.mrb[0].mxu1 %v163_v25 }
 0x1f5   :  { %v269_v27 = vpop.f32.mrb[0].mxu1 }
 0x1f6   :  { %v270_v28 = vadd.f32 %v301_v26, %v269_v27  ;;  %v366_v29 = vpop.f32.mrb[1].mxu1 }
 0x1f7   :  { %v272_v30 = vpop.f32.mrb[2].mxu1 }
 0x1f8   :  { %275 = vst [vmem:[#allocation7] sm:$0xff] %v270_v28  ;;  %v367_v31 = vpop.f32.mrb[3].mxu1 }
 0x1f9   :  { %446 = shalt.err (!%p443_p6)
}
 0x1fa   :  { %s447_s4 = scalar_lea.hbm %s550_s5, 128 }
 0x1fb   :  { %p448_p7 = scmp.ne.s32.totalorder %s550_s5, %s447_s4  ;;  %p451_p8 = scmp.lt.u32.totalorder %s447_s4, %s550_s5 }
 0x1fd   :  { %p453_p9 = pnand %p451_p8, %p448_p7 }
 0x1ff   :  { %456 = shalt.err (!%p453_p9)
}
 0x200   :  { %285 = dma.vmem_to_hbm [thread:$0]  %s283_s23, 128, %s550_s5, [#allocation4]  }
 0x201   :  { %461 = dma.done.wait [#allocation4], 128  }
 0x202   :  { %462 = vsyncadd [#allocation4], 4294967168 }
 0x203   :  { %289 = vsyncpa [#allocation3], 1 }
 0x204   :  { %290 = vsyncpa [#allocation6], 1 }
 0x205   :  { %291 = vsyncpa [#allocation4], 1 }

</bundles_post_ra>
